<compile_context>
chip_gen: v5e
topology: v5e:2x2
jax: 0.10.0
libtpu: 0.0.40
codegen_flags: <defaults>
</compile_context>

<pallas_src>
import math

import jax
import jax.numpy as jnp
from jax.experimental import pallas as pl
from jax.experimental.pallas import tpu as pltpu


def make_attention_kernel(no_heads: int, c_hidden: int, bias_block_shape):
    """bias_block_shape: static (B_bias_blk, Hb, Qb, Kb) block shape of the bias."""
    scale = 1.0 / math.sqrt(c_hidden)
    _, Hb, _, _ = bias_block_shape

    def kernel(qx_ref, kvx_ref, bias_ref,
               wq_ref, wk_ref, wv_ref, wg_ref, bg_ref, wo_ref, bo_ref,
               out_ref):
        Bb, Q, Cq = qx_ref.shape
        _, K, Ck = kvx_ref.shape

        qx2 = qx_ref[...].reshape(Bb * Q, Cq)      # bf16
        kvx2 = kvx_ref[...].reshape(Bb * K, Ck)    # bf16

        # ---- fused, full-HC-width projections: one MXU matmul each ----
        q_all = jnp.dot(qx2, wq_ref[...],
                        preferred_element_type=jnp.float32) * scale       # [Bb*Q, HC]
        k_all = jnp.dot(kvx2, wk_ref[...],
                        preferred_element_type=jnp.float32)               # [Bb*K, HC]
        v_all = jnp.dot(kvx2, wv_ref[...],
                        preferred_element_type=jnp.float32)               # [Bb*K, HC]
        g_all = jax.nn.sigmoid(
            jnp.dot(qx2, wg_ref[...], preferred_element_type=jnp.float32)
            + bg_ref[...])                                                 # [Bb*Q, HC] f32

        q_b = q_all.astype(jnp.bfloat16)
        k_b = k_all.astype(jnp.bfloat16)
        v_b = v_all.astype(jnp.bfloat16)

        bias = bias_ref[...]                                               # [B0, Hb, Qb, Kb] f32

        o_heads = []
        for h in range(no_heads):
            lo, hi = h * c_hidden, (h + 1) * c_hidden
            qh = q_b[:, lo:hi].reshape(Bb, Q, c_hidden)
            kh = k_b[:, lo:hi].reshape(Bb, K, c_hidden)
            vh = v_b[:, lo:hi].reshape(Bb, K, c_hidden)

            # scores: batched over Bb, contract hidden dim directly (no explicit .T)
            s = jax.lax.dot_general(
                qh, kh, (((2,), (2,)), ((0,), (0,))),
                preferred_element_type=jnp.float32)                        # [Bb, Q, K]

            # bias broadcast (over H / Q / K as needed) happens on the VPU here
            bh = bias[:, h if Hb == no_heads else 0]                       # [B0, Qb, Kb]
            s = s + bh

            s = s - jnp.max(s, axis=-1, keepdims=True)
            p = jnp.exp(s)
            p = p * pl.reciprocal(jnp.sum(p, axis=-1, keepdims=True), approx=True)

            oh = jax.lax.dot_general(
                p.astype(jnp.bfloat16), vh, (((2,), (1,)), ((0,), (0,))),
                preferred_element_type=jnp.float32)                         # [Bb, Q, Ch]
            o_heads.append(oh.reshape(Bb * Q, c_hidden))

        # gate + single fused HC-wide output projection
        o_full = jnp.concatenate(o_heads, axis=-1) * g_all                  # [Bb*Q, HC] f32
        out = jnp.dot(o_full.astype(jnp.bfloat16), wo_ref[...],
                      preferred_element_type=jnp.float32) + bo_ref[...]     # [Bb*Q, Cq]
        out_ref[...] = out.reshape(Bb, Q, Cq)

    return kernel


def _pick_batch_block(B: int, max_blk: int = 8) -> int:
    for d in range(min(B, max_blk), 0, -1):
        if B % d == 0:
            return d
    return 1


def attention_pallas(q_x, kv_x, bias, params, *, no_heads, c_hidden):
    wq, wk, wv, wg, bg, wo, bo = params
    B, Q, Cq = q_x.shape
    _, K, Ck = kv_x.shape
    HC = no_heads * c_hidden

    B_blk = _pick_batch_block(B)
    grid = (B // B_blk,)

    # bf16 MXU operands (accumulation stays f32 inside the kernel).
    q_x_b = q_x.astype(jnp.bfloat16)
    kv_x_b = kv_x.astype(jnp.bfloat16)
    wq_b, wk_b, wv_b, wg_b, wo_b = (
        w.astype(jnp.bfloat16) for w in (wq, wk, wv, wg, wo))
    bg2 = bg.reshape(1, HC).astype(jnp.float32)
    bo2 = bo.reshape(1, Cq).astype(jnp.float32)

    # Keep the bias un-broadcast over H/Q/K (VPU broadcast in-kernel); only make it rank-4.
    bias = jnp.asarray(bias, jnp.float32)
    while bias.ndim < 4:
        bias = bias[None]
    B0, Hb, Qb, Kb = bias.shape
    assert B0 in (1, B) and Hb in (1, no_heads) and Qb in (1, Q) and Kb in (1, K)
    bias_blk = (B_blk if B0 == B else 1, Hb, Qb, Kb)
    bias_idx = (lambda b: (b, 0, 0, 0)) if B0 == B else (lambda b: (0, 0, 0, 0))

    kernel = make_attention_kernel(no_heads, c_hidden, bias_blk)

    # Explicit scoped-VMEM budget from the chosen block sizes (double-buffered
    # blocks + f32 intermediates), clamped to a safe range for v5e/v6e/v7x.
    act_bytes = 2 * (B_blk * Q * Cq * 2 + B_blk * K * Ck * 2
                     + bias_blk[0] * Hb * Qb * Kb * 4
                     + B_blk * Q * Cq * 4)
    w_bytes = 2 * 2 * int(wq.size + wk.size + wv.size + wg.size + wo.size) \
        + 2 * 4 * (HC + Cq)
    inter_bytes = 4 * 4 * B_blk * Q * HC + 3 * 4 * B_blk * K * HC \
        + 4 * 4 * B_blk * Q * K
    vmem_limit = int(min(64 << 20,
                         max(16 << 20, 4 * (act_bytes + w_bytes + inter_bytes))))

    return pl.pallas_call(
        kernel,
        out_shape=jax.ShapeDtypeStruct((B, Q, Cq), jnp.float32),
        grid_spec=pltpu.PrefetchScalarGridSpec(
            num_scalar_prefetch=0,
            grid=grid,
            in_specs=[
                pl.BlockSpec((B_blk, Q, Cq), lambda b: (b, 0, 0)),
                pl.BlockSpec((B_blk, K, Ck), lambda b: (b, 0, 0)),
                pl.BlockSpec(bias_blk, bias_idx),
                pl.BlockSpec(wq_b.shape, lambda b: (0, 0)),
                pl.BlockSpec(wk_b.shape, lambda b: (0, 0)),
                pl.BlockSpec(wv_b.shape, lambda b: (0, 0)),
                pl.BlockSpec(wg_b.shape, lambda b: (0, 0)),
                pl.BlockSpec((1, HC), lambda b: (0, 0)),
                pl.BlockSpec(wo_b.shape, lambda b: (0, 0)),
                pl.BlockSpec((1, Cq), lambda b: (0, 0)),
            ],
            out_specs=pl.BlockSpec((B_blk, Q, Cq), lambda b: (b, 0, 0)),
        ),
        compiler_params=pltpu.CompilerParams(
            dimension_semantics=("parallel",),
            vmem_limit_bytes=vmem_limit),
    )(q_x_b, kv_x_b, bias, wq_b, wk_b, wv_b, wg_b, bg2, wo_b, bo2)


def attention_ref(q_x, kv_x, bias, params, *, no_heads, c_hidden):
    """Pure-JAX f32 reference mirroring the PyTorch forward."""
    wq, wk, wv, wg, bg, wo, bo = params
    B, Q, Cq = q_x.shape
    _, K, _ = kv_x.shape
    H, C = no_heads, c_hidden
    q = (q_x @ wq).reshape(B, Q, H, C) / math.sqrt(C)
    k = (kv_x @ wk).reshape(B, K, H, C)
    v = (kv_x @ wv).reshape(B, K, H, C)
    a = jnp.einsum("bqhc,bkhc->bhqk", q, k) + bias
    a = jax.nn.softmax(a, axis=-1)
    o = jnp.einsum("bhqk,bkhc->bqhc", a, v)
    g = jax.nn.sigmoid(q_x @ wg + bg).reshape(B, Q, H, C)
    o = o * g
    o = o.reshape(B, Q, H * C) @ wo + bo
    return o


if __name__ == "__main__":
    # Small shapes consistent with the module's forward.
    B, Q, K = 2, 8, 8
    C_q = C_k = C_v = 32
    C_HIDDEN, NO_HEADS = 16, 4
    HC = C_HIDDEN * NO_HEADS

    key = jax.random.PRNGKey(0)
    ks = jax.random.split(key, 10)
    q_x = jax.random.normal(ks[0], (B, Q, C_q), jnp.float32)
    kv_x = jax.random.normal(ks[1], (B, K, C_k), jnp.float32)
    # One bias that broadcasts to [B, H, Q, K].
    bias = jax.random.normal(ks[2], (B, 1, 1, K), jnp.float32)

    # Deterministic parameter init (stored [in, out], i.e. torch W.T).
    def init(k, shape, fan_in):
        return jax.random.normal(k, shape, jnp.float32) / math.sqrt(fan_in)

    wq = init(ks[3], (C_q, HC), C_q)
    wk = init(ks[4], (C_k, HC), C_k)
    wv = init(ks[5], (C_v, HC), C_v)
    wg = init(ks[6], (C_q, HC), C_q)
    bg = jax.random.normal(ks[7], (HC,), jnp.float32) * 0.1
    wo = init(ks[8], (HC, C_q), HC)
    bo = jax.random.normal(ks[9], (C_q,), jnp.float32) * 0.1
    params = (wq, wk, wv, wg, bg, wo, bo)

    out = attention_pallas(q_x, kv_x, bias, params,
                           no_heads=NO_HEADS, c_hidden=C_HIDDEN)
    out = jax.block_until_ready(out)

    ref = attention_ref(q_x, kv_x, bias, params,
                        no_heads=NO_HEADS, c_hidden=C_HIDDEN)
    assert out.shape == (B, Q, C_q)
    # bf16 MXU operands + approx reciprocal -> loosened tolerance vs f32 reference.
    assert jnp.allclose(out, ref, atol=5e-2, rtol=5e-2), (
        float(jnp.max(jnp.abs(out - ref))))
    print("KERNEL_OK")
</pallas_src>

<mosaic_0001>
module attributes {stable_mosaic.version = 11 : i64} {
  func.func @kernel(%arg0: i32, %arg1: memref<2x8x32xbf16, #tpu.memory_space<vmem>>, %arg2: memref<2x8x32xbf16, #tpu.memory_space<vmem>>, %arg3: memref<2x1x1x8xf32, #tpu.memory_space<vmem>>, %arg4: memref<32x64xbf16, #tpu.memory_space<vmem>>, %arg5: memref<32x64xbf16, #tpu.memory_space<vmem>>, %arg6: memref<32x64xbf16, #tpu.memory_space<vmem>>, %arg7: memref<32x64xbf16, #tpu.memory_space<vmem>>, %arg8: memref<1x64xf32, #tpu.memory_space<vmem>>, %arg9: memref<64x32xbf16, #tpu.memory_space<vmem>>, %arg10: memref<1x32xf32, #tpu.memory_space<vmem>>, %arg11: memref<2x8x32xf32, #tpu.memory_space<vmem>>) attributes {dimension_semantics = [#tpu.dimension_semantics<parallel>], iteration_bounds = array<i64: 1>, scalar_prefetch = 0 : i64, scratch_operands = 0 : i64, tpu.core_type = #tpu.core_type<tc>, window_params = [{transform_indices = @transform_0, window_bounds = array<i64: 2, 8, 32>}, {transform_indices = @transform_1, window_bounds = array<i64: 2, 8, 32>}, {transform_indices = @transform_2, window_bounds = array<i64: 2, 1, 1, 8>}, {pipeline_mode = #tpu.pipeline_mode<synchronous>, transform_indices = @transform_3, window_bounds = array<i64: 32, 64>}, {pipeline_mode = #tpu.pipeline_mode<synchronous>, transform_indices = @transform_4, window_bounds = array<i64: 32, 64>}, {pipeline_mode = #tpu.pipeline_mode<synchronous>, transform_indices = @transform_5, window_bounds = array<i64: 32, 64>}, {pipeline_mode = #tpu.pipeline_mode<synchronous>, transform_indices = @transform_6, window_bounds = array<i64: 32, 64>}, {pipeline_mode = #tpu.pipeline_mode<synchronous>, transform_indices = @transform_7, window_bounds = array<i64: 1, 64>}, {pipeline_mode = #tpu.pipeline_mode<synchronous>, transform_indices = @transform_8, window_bounds = array<i64: 64, 32>}, {pipeline_mode = #tpu.pipeline_mode<synchronous>, transform_indices = @transform_9, window_bounds = array<i64: 1, 32>}, {transform_indices = @transform_10, window_bounds = array<i64: 2, 8, 32>}]} {
    %c0 = arith.constant 0 : index
    %c0_0 = arith.constant 0 : index
    %c0_1 = arith.constant 0 : index
    %0 = vector.load %arg1[%c0, %c0_0, %c0_1] : memref<2x8x32xbf16, #tpu.memory_space<vmem>>, vector<2x8x32xbf16>
    %1 = vector.shape_cast %0 : vector<2x8x32xbf16> to vector<16x32xbf16>
    %c0_2 = arith.constant 0 : index
    %c0_3 = arith.constant 0 : index
    %c0_4 = arith.constant 0 : index
    %2 = vector.load %arg2[%c0_2, %c0_3, %c0_4] : memref<2x8x32xbf16, #tpu.memory_space<vmem>>, vector<2x8x32xbf16>
    %3 = vector.shape_cast %2 : vector<2x8x32xbf16> to vector<16x32xbf16>
    %c0_5 = arith.constant 0 : index
    %c0_6 = arith.constant 0 : index
    %4 = vector.load %arg4[%c0_5, %c0_6] : memref<32x64xbf16, #tpu.memory_space<vmem>>, vector<32x64xbf16>
    %cst = arith.constant dense<0.000000e+00> : vector<16x64xf32>
    %5 = tpu.matmul %1, %4, %cst {dimension_numbers = #tpu.dot_dimension_numbers<[1], [0], [0], [1], [0, 0, 1, 1], [], []>} : vector<16x32xbf16>, vector<32x64xbf16>, vector<16x64xf32> -> vector<16x64xf32>
    %cst_7 = arith.constant 2.500000e-01 : f32
    %6 = vector.broadcast %cst_7 : f32 to vector<16x64xf32>
    %7 = arith.mulf %5, %6 : vector<16x64xf32>
    %c0_8 = arith.constant 0 : index
    %c0_9 = arith.constant 0 : index
    %8 = vector.load %arg5[%c0_8, %c0_9] : memref<32x64xbf16, #tpu.memory_space<vmem>>, vector<32x64xbf16>
    %cst_10 = arith.constant dense<0.000000e+00> : vector<16x64xf32>
    %9 = tpu.matmul %3, %8, %cst_10 {dimension_numbers = #tpu.dot_dimension_numbers<[1], [0], [0], [1], [0, 0, 1, 1], [], []>} : vector<16x32xbf16>, vector<32x64xbf16>, vector<16x64xf32> -> vector<16x64xf32>
    %c0_11 = arith.constant 0 : index
    %c0_12 = arith.constant 0 : index
    %10 = vector.load %arg6[%c0_11, %c0_12] : memref<32x64xbf16, #tpu.memory_space<vmem>>, vector<32x64xbf16>
    %cst_13 = arith.constant dense<0.000000e+00> : vector<16x64xf32>
    %11 = tpu.matmul %3, %10, %cst_13 {dimension_numbers = #tpu.dot_dimension_numbers<[1], [0], [0], [1], [0, 0, 1, 1], [], []>} : vector<16x32xbf16>, vector<32x64xbf16>, vector<16x64xf32> -> vector<16x64xf32>
    %c0_14 = arith.constant 0 : index
    %c0_15 = arith.constant 0 : index
    %12 = vector.load %arg7[%c0_14, %c0_15] : memref<32x64xbf16, #tpu.memory_space<vmem>>, vector<32x64xbf16>
    %cst_16 = arith.constant dense<0.000000e+00> : vector<16x64xf32>
    %13 = tpu.matmul %1, %12, %cst_16 {dimension_numbers = #tpu.dot_dimension_numbers<[1], [0], [0], [1], [0, 0, 1, 1], [], []>} : vector<16x32xbf16>, vector<32x64xbf16>, vector<16x64xf32> -> vector<16x64xf32>
    %c0_17 = arith.constant 0 : index
    %c0_18 = arith.constant 0 : index
    %14 = vector.load %arg8[%c0_17, %c0_18] : memref<1x64xf32, #tpu.memory_space<vmem>>, vector<1x64xf32>
    %15 = vector.broadcast %14 : vector<1x64xf32> to vector<16x64xf32>
    %16 = arith.addf %13, %15 : vector<16x64xf32>
    %17 = arith.negf %16 : vector<16x64xf32>
    %18 = math.exp %17 : vector<16x64xf32>
    %cst_19 = arith.constant 1.000000e+00 : f32
    %19 = vector.broadcast %cst_19 : f32 to vector<16x64xf32>
    %20 = arith.addf %19, %18 : vector<16x64xf32>
    %21 = arith.divf %19, %20 : vector<16x64xf32>
    %22 = arith.truncf %7 : vector<16x64xf32> to vector<16x64xbf16>
    %23 = arith.truncf %9 : vector<16x64xf32> to vector<16x64xbf16>
    %24 = arith.truncf %11 : vector<16x64xf32> to vector<16x64xbf16>
    %c0_20 = arith.constant 0 : index
    %c0_21 = arith.constant 0 : index
    %c0_22 = arith.constant 0 : index
    %c0_23 = arith.constant 0 : index
    %25 = vector.load %arg3[%c0_20, %c0_21, %c0_22, %c0_23] : memref<2x1x1x8xf32, #tpu.memory_space<vmem>>, vector<2x1x1x8xf32>
    %26 = vector.extract_strided_slice %22 {offsets = [0, 0], sizes = [16, 16], strides = [1, 1]} : vector<16x64xbf16> to vector<16x16xbf16>
    %27 = vector.shape_cast %26 : vector<16x16xbf16> to vector<2x8x16xbf16>
    %28 = vector.extract_strided_slice %23 {offsets = [0, 0], sizes = [16, 16], strides = [1, 1]} : vector<16x64xbf16> to vector<16x16xbf16>
    %29 = vector.shape_cast %28 : vector<16x16xbf16> to vector<2x8x16xbf16>
    %30 = vector.extract_strided_slice %24 {offsets = [0, 0], sizes = [16, 16], strides = [1, 1]} : vector<16x64xbf16> to vector<16x16xbf16>
    %31 = vector.shape_cast %30 : vector<16x16xbf16> to vector<2x8x16xbf16>
    %cst_24 = arith.constant dense<0.000000e+00> : vector<2x8x8xf32>
    %32 = tpu.matmul %27, %29, %cst_24 {dimension_numbers = #tpu.dot_dimension_numbers<[2], [2], [1], [1], [0, 0, 0, 1, 1, 1], [0], [0]>} : vector<2x8x16xbf16>, vector<2x8x16xbf16>, vector<2x8x8xf32> -> vector<2x8x8xf32>
    %33 = vector.shape_cast %25 : vector<2x1x1x8xf32> to vector<2x1x8xf32>
    %34 = vector.broadcast %33 : vector<2x1x8xf32> to vector<2x8x8xf32>
    %35 = arith.addf %32, %34 : vector<2x8x8xf32>
    %cst_25 = arith.constant dense<0xFF800000> : vector<2x8xf32>
    %36 = vector.multi_reduction <maximumf>, %35, %cst_25 [2] : vector<2x8x8xf32> to vector<2x8xf32>
    %37 = vector.shape_cast %36 : vector<2x8xf32> to vector<2x8x1xf32>
    %38 = vector.broadcast %37 : vector<2x8x1xf32> to vector<2x8x8xf32>
    %39 = arith.subf %35, %38 : vector<2x8x8xf32>
    %40 = math.exp %39 : vector<2x8x8xf32>
    %cst_26 = arith.constant dense<0.000000e+00> : vector<2x8xf32>
    %41 = vector.multi_reduction <add>, %40, %cst_26 [2] : vector<2x8x8xf32> to vector<2x8xf32>
    %42 = vector.shape_cast %41 : vector<2x8xf32> to vector<2x8x1xf32>
    %43 = tpu.reciprocal %42 {approx = true} : vector<2x8x1xf32> -> vector<2x8x1xf32>
    %44 = vector.broadcast %43 : vector<2x8x1xf32> to vector<2x8x8xf32>
    %45 = arith.mulf %40, %44 : vector<2x8x8xf32>
    %46 = arith.truncf %45 : vector<2x8x8xf32> to vector<2x8x8xbf16>
    %cst_27 = arith.constant dense<0.000000e+00> : vector<2x8x16xf32>
    %47 = tpu.matmul %46, %31, %cst_27 {dimension_numbers = #tpu.dot_dimension_numbers<[2], [1], [1], [2], [0, 0, 0, 1, 1, 2], [0], [0]>} : vector<2x8x8xbf16>, vector<2x8x16xbf16>, vector<2x8x16xf32> -> vector<2x8x16xf32>
    %48 = vector.shape_cast %47 : vector<2x8x16xf32> to vector<16x16xf32>
    %49 = vector.extract_strided_slice %22 {offsets = [0, 16], sizes = [16, 16], strides = [1, 1]} : vector<16x64xbf16> to vector<16x16xbf16>
    %50 = vector.shape_cast %49 : vector<16x16xbf16> to vector<2x8x16xbf16>
    %51 = vector.extract_strided_slice %23 {offsets = [0, 16], sizes = [16, 16], strides = [1, 1]} : vector<16x64xbf16> to vector<16x16xbf16>
    %52 = vector.shape_cast %51 : vector<16x16xbf16> to vector<2x8x16xbf16>
    %53 = vector.extract_strided_slice %24 {offsets = [0, 16], sizes = [16, 16], strides = [1, 1]} : vector<16x64xbf16> to vector<16x16xbf16>
    %54 = vector.shape_cast %53 : vector<16x16xbf16> to vector<2x8x16xbf16>
    %cst_28 = arith.constant dense<0.000000e+00> : vector<2x8x8xf32>
    %55 = tpu.matmul %50, %52, %cst_28 {dimension_numbers = #tpu.dot_dimension_numbers<[2], [2], [1], [1], [0, 0, 0, 1, 1, 1], [0], [0]>} : vector<2x8x16xbf16>, vector<2x8x16xbf16>, vector<2x8x8xf32> -> vector<2x8x8xf32>
    %56 = vector.shape_cast %25 : vector<2x1x1x8xf32> to vector<2x1x8xf32>
    %57 = vector.broadcast %56 : vector<2x1x8xf32> to vector<2x8x8xf32>
    %58 = arith.addf %55, %57 : vector<2x8x8xf32>
    %cst_29 = arith.constant dense<0xFF800000> : vector<2x8xf32>
    %59 = vector.multi_reduction <maximumf>, %58, %cst_29 [2] : vector<2x8x8xf32> to vector<2x8xf32>
    %60 = vector.shape_cast %59 : vector<2x8xf32> to vector<2x8x1xf32>
    %61 = vector.broadcast %60 : vector<2x8x1xf32> to vector<2x8x8xf32>
    %62 = arith.subf %58, %61 : vector<2x8x8xf32>
    %63 = math.exp %62 : vector<2x8x8xf32>
    %cst_30 = arith.constant dense<0.000000e+00> : vector<2x8xf32>
    %64 = vector.multi_reduction <add>, %63, %cst_30 [2] : vector<2x8x8xf32> to vector<2x8xf32>
    %65 = vector.shape_cast %64 : vector<2x8xf32> to vector<2x8x1xf32>
    %66 = tpu.reciprocal %65 {approx = true} : vector<2x8x1xf32> -> vector<2x8x1xf32>
    %67 = vector.broadcast %66 : vector<2x8x1xf32> to vector<2x8x8xf32>
    %68 = arith.mulf %63, %67 : vector<2x8x8xf32>
    %69 = arith.truncf %68 : vector<2x8x8xf32> to vector<2x8x8xbf16>
    %cst_31 = arith.constant dense<0.000000e+00> : vector<2x8x16xf32>
    %70 = tpu.matmul %69, %54, %cst_31 {dimension_numbers = #tpu.dot_dimension_numbers<[2], [1], [1], [2], [0, 0, 0, 1, 1, 2], [0], [0]>} : vector<2x8x8xbf16>, vector<2x8x16xbf16>, vector<2x8x16xf32> -> vector<2x8x16xf32>
    %71 = vector.shape_cast %70 : vector<2x8x16xf32> to vector<16x16xf32>
    %72 = vector.extract_strided_slice %22 {offsets = [0, 32], sizes = [16, 16], strides = [1, 1]} : vector<16x64xbf16> to vector<16x16xbf16>
    %73 = vector.shape_cast %72 : vector<16x16xbf16> to vector<2x8x16xbf16>
    %74 = vector.extract_strided_slice %23 {offsets = [0, 32], sizes = [16, 16], strides = [1, 1]} : vector<16x64xbf16> to vector<16x16xbf16>
    %75 = vector.shape_cast %74 : vector<16x16xbf16> to vector<2x8x16xbf16>
    %76 = vector.extract_strided_slice %24 {offsets = [0, 32], sizes = [16, 16], strides = [1, 1]} : vector<16x64xbf16> to vector<16x16xbf16>
    %77 = vector.shape_cast %76 : vector<16x16xbf16> to vector<2x8x16xbf16>
    %cst_32 = arith.constant dense<0.000000e+00> : vector<2x8x8xf32>
    %78 = tpu.matmul %73, %75, %cst_32 {dimension_numbers = #tpu.dot_dimension_numbers<[2], [2], [1], [1], [0, 0, 0, 1, 1, 1], [0], [0]>} : vector<2x8x16xbf16>, vector<2x8x16xbf16>, vector<2x8x8xf32> -> vector<2x8x8xf32>
    %79 = vector.shape_cast %25 : vector<2x1x1x8xf32> to vector<2x1x8xf32>
    %80 = vector.broadcast %79 : vector<2x1x8xf32> to vector<2x8x8xf32>
    %81 = arith.addf %78, %80 : vector<2x8x8xf32>
    %cst_33 = arith.constant dense<0xFF800000> : vector<2x8xf32>
    %82 = vector.multi_reduction <maximumf>, %81, %cst_33 [2] : vector<2x8x8xf32> to vector<2x8xf32>
    %83 = vector.shape_cast %82 : vector<2x8xf32> to vector<2x8x1xf32>
    %84 = vector.broadcast %83 : vector<2x8x1xf32> to vector<2x8x8xf32>
    %85 = arith.subf %81, %84 : vector<2x8x8xf32>
    %86 = math.exp %85 : vector<2x8x8xf32>
    %cst_34 = arith.constant dense<0.000000e+00> : vector<2x8xf32>
    %87 = vector.multi_reduction <add>, %86, %cst_34 [2] : vector<2x8x8xf32> to vector<2x8xf32>
    %88 = vector.shape_cast %87 : vector<2x8xf32> to vector<2x8x1xf32>
    %89 = tpu.reciprocal %88 {approx = true} : vector<2x8x1xf32> -> vector<2x8x1xf32>
    %90 = vector.broadcast %89 : vector<2x8x1xf32> to vector<2x8x8xf32>
    %91 = arith.mulf %86, %90 : vector<2x8x8xf32>
    %92 = arith.truncf %91 : vector<2x8x8xf32> to vector<2x8x8xbf16>
    %cst_35 = arith.constant dense<0.000000e+00> : vector<2x8x16xf32>
    %93 = tpu.matmul %92, %77, %cst_35 {dimension_numbers = #tpu.dot_dimension_numbers<[2], [1], [1], [2], [0, 0, 0, 1, 1, 2], [0], [0]>} : vector<2x8x8xbf16>, vector<2x8x16xbf16>, vector<2x8x16xf32> -> vector<2x8x16xf32>
    %94 = vector.shape_cast %93 : vector<2x8x16xf32> to vector<16x16xf32>
    %95 = vector.extract_strided_slice %22 {offsets = [0, 48], sizes = [16, 16], strides = [1, 1]} : vector<16x64xbf16> to vector<16x16xbf16>
    %96 = vector.shape_cast %95 : vector<16x16xbf16> to vector<2x8x16xbf16>
    %97 = vector.extract_strided_slice %23 {offsets = [0, 48], sizes = [16, 16], strides = [1, 1]} : vector<16x64xbf16> to vector<16x16xbf16>
    %98 = vector.shape_cast %97 : vector<16x16xbf16> to vector<2x8x16xbf16>
    %99 = vector.extract_strided_slice %24 {offsets = [0, 48], sizes = [16, 16], strides = [1, 1]} : vector<16x64xbf16> to vector<16x16xbf16>
    %100 = vector.shape_cast %99 : vector<16x16xbf16> to vector<2x8x16xbf16>
    %cst_36 = arith.constant dense<0.000000e+00> : vector<2x8x8xf32>
    %101 = tpu.matmul %96, %98, %cst_36 {dimension_numbers = #tpu.dot_dimension_numbers<[2], [2], [1], [1], [0, 0, 0, 1, 1, 1], [0], [0]>} : vector<2x8x16xbf16>, vector<2x8x16xbf16>, vector<2x8x8xf32> -> vector<2x8x8xf32>
    %102 = vector.shape_cast %25 : vector<2x1x1x8xf32> to vector<2x1x8xf32>
    %103 = vector.broadcast %102 : vector<2x1x8xf32> to vector<2x8x8xf32>
    %104 = arith.addf %101, %103 : vector<2x8x8xf32>
    %cst_37 = arith.constant dense<0xFF800000> : vector<2x8xf32>
    %105 = vector.multi_reduction <maximumf>, %104, %cst_37 [2] : vector<2x8x8xf32> to vector<2x8xf32>
    %106 = vector.shape_cast %105 : vector<2x8xf32> to vector<2x8x1xf32>
    %107 = vector.broadcast %106 : vector<2x8x1xf32> to vector<2x8x8xf32>
    %108 = arith.subf %104, %107 : vector<2x8x8xf32>
    %109 = math.exp %108 : vector<2x8x8xf32>
    %cst_38 = arith.constant dense<0.000000e+00> : vector<2x8xf32>
    %110 = vector.multi_reduction <add>, %109, %cst_38 [2] : vector<2x8x8xf32> to vector<2x8xf32>
    %111 = vector.shape_cast %110 : vector<2x8xf32> to vector<2x8x1xf32>
    %112 = tpu.reciprocal %111 {approx = true} : vector<2x8x1xf32> -> vector<2x8x1xf32>
    %113 = vector.broadcast %112 : vector<2x8x1xf32> to vector<2x8x8xf32>
    %114 = arith.mulf %109, %113 : vector<2x8x8xf32>
    %115 = arith.truncf %114 : vector<2x8x8xf32> to vector<2x8x8xbf16>
    %cst_39 = arith.constant dense<0.000000e+00> : vector<2x8x16xf32>
    %116 = tpu.matmul %115, %100, %cst_39 {dimension_numbers = #tpu.dot_dimension_numbers<[2], [1], [1], [2], [0, 0, 0, 1, 1, 2], [0], [0]>} : vector<2x8x8xbf16>, vector<2x8x16xbf16>, vector<2x8x16xf32> -> vector<2x8x16xf32>
    %117 = vector.shape_cast %116 : vector<2x8x16xf32> to vector<16x16xf32>
    %118 = tpu.concatenate %48, %71, %94, %117 in 1 : vector<16x16xf32>, vector<16x16xf32>, vector<16x16xf32>, vector<16x16xf32> -> vector<16x64xf32>
    %119 = arith.mulf %118, %21 : vector<16x64xf32>
    %120 = arith.truncf %119 : vector<16x64xf32> to vector<16x64xbf16>
    %c0_40 = arith.constant 0 : index
    %c0_41 = arith.constant 0 : index
    %121 = vector.load %arg9[%c0_40, %c0_41] : memref<64x32xbf16, #tpu.memory_space<vmem>>, vector<64x32xbf16>
    %cst_42 = arith.constant dense<0.000000e+00> : vector<16x32xf32>
    %122 = tpu.matmul %120, %121, %cst_42 {dimension_numbers = #tpu.dot_dimension_numbers<[1], [0], [0], [1], [0, 0, 1, 1], [], []>} : vector<16x64xbf16>, vector<64x32xbf16>, vector<16x32xf32> -> vector<16x32xf32>
    %c0_43 = arith.constant 0 : index
    %c0_44 = arith.constant 0 : index
    %123 = vector.load %arg10[%c0_43, %c0_44] : memref<1x32xf32, #tpu.memory_space<vmem>>, vector<1x32xf32>
    %124 = vector.broadcast %123 : vector<1x32xf32> to vector<16x32xf32>
    %125 = arith.addf %122, %124 : vector<16x32xf32>
    %126 = vector.shape_cast %125 : vector<16x32xf32> to vector<2x8x32xf32>
    %c0_45 = arith.constant 0 : index
    %c0_46 = arith.constant 0 : index
    %c0_47 = arith.constant 0 : index
    %127 = vector.load %arg11[%c0_45, %c0_46, %c0_47] : memref<2x8x32xf32, #tpu.memory_space<vmem>>, vector<2x8x32xf32>
    tpu.vector_store %arg11[%c0_45, %c0_46, %c0_47], %126 {strides = array<i32>} : memref<2x8x32xf32, #tpu.memory_space<vmem>>, vector<2x8x32xf32>,
    return
  }
  func.func @transform_0(%arg0: i32) -> (i32, i32, i32) {
    %c0_i32 = arith.constant 0 : i32
    %c0_i32_0 = arith.constant 0 : i32
    %c0_i32_1 = arith.constant 0 : i32
    return %arg0, %c0_i32, %c0_i32_0 : i32, i32, i32
  }
  func.func @transform_1(%arg0: i32) -> (i32, i32, i32) {
    %c0_i32 = arith.constant 0 : i32
    %c0_i32_0 = arith.constant 0 : i32
    %c0_i32_1 = arith.constant 0 : i32
    return %arg0, %c0_i32, %c0_i32_0 : i32, i32, i32
  }
  func.func @transform_2(%arg0: i32) -> (i32, i32, i32, i32) {
    %c0_i32 = arith.constant 0 : i32
    %c0_i32_0 = arith.constant 0 : i32
    %c0_i32_1 = arith.constant 0 : i32
    %c0_i32_2 = arith.constant 0 : i32
    return %arg0, %c0_i32, %c0_i32_0, %c0_i32_1 : i32, i32, i32, i32
  }
  func.func @transform_3(%arg0: i32) -> (i32, i32) {
    %c0_i32 = arith.constant 0 : i32
    %c0_i32_0 = arith.constant 0 : i32
    %c0_i32_1 = arith.constant 0 : i32
    return %c0_i32, %c0_i32_0 : i32, i32
  }
  func.func @transform_4(%arg0: i32) -> (i32, i32) {
    %c0_i32 = arith.constant 0 : i32
    %c0_i32_0 = arith.constant 0 : i32
    %c0_i32_1 = arith.constant 0 : i32
    return %c0_i32, %c0_i32_0 : i32, i32
  }
  func.func @transform_5(%arg0: i32) -> (i32, i32) {
    %c0_i32 = arith.constant 0 : i32
    %c0_i32_0 = arith.constant 0 : i32
    %c0_i32_1 = arith.constant 0 : i32
    return %c0_i32, %c0_i32_0 : i32, i32
  }
  func.func @transform_6(%arg0: i32) -> (i32, i32) {
    %c0_i32 = arith.constant 0 : i32
    %c0_i32_0 = arith.constant 0 : i32
    %c0_i32_1 = arith.constant 0 : i32
    return %c0_i32, %c0_i32_0 : i32, i32
  }
  func.func @transform_7(%arg0: i32) -> (i32, i32) {
    %c0_i32 = arith.constant 0 : i32
    %c0_i32_0 = arith.constant 0 : i32
    %c0_i32_1 = arith.constant 0 : i32
    return %c0_i32, %c0_i32_0 : i32, i32
  }
  func.func @transform_8(%arg0: i32) -> (i32, i32) {
    %c0_i32 = arith.constant 0 : i32
    %c0_i32_0 = arith.constant 0 : i32
    %c0_i32_1 = arith.constant 0 : i32
    return %c0_i32, %c0_i32_0 : i32, i32
  }
  func.func @transform_9(%arg0: i32) -> (i32, i32) {
    %c0_i32 = arith.constant 0 : i32
    %c0_i32_0 = arith.constant 0 : i32
    %c0_i32_1 = arith.constant 0 : i32
    return %c0_i32, %c0_i32_0 : i32, i32
  }
  func.func @transform_10(%arg0: i32) -> (i32, i32, i32) {
    %c0_i32 = arith.constant 0 : i32
    %c0_i32_0 = arith.constant 0 : i32
    %c0_i32_1 = arith.constant 0 : i32
    return %arg0, %c0_i32, %c0_i32_0 : i32, i32, i32
  }
}

</mosaic_0001>

<bundles_post_ra>
// kernel: tpu_custom_call.1
= control target key start
LH: loop header
LB: loop body
LE: loop exit
PB: predicated region body
PF: predicated region fallthrough
CT: control target
= control target key end

     0   :  { %15 = vsyncpa [#allocation3], 0  ;;  %s1398_s0 = inlined_call_operand.hbm [shape: bf16[2,8,32], index: 0, kind: input, shape index: {}]   ;;  %s1399_s1 = inlined_call_operand.hbm [shape: bf16[2,8,32], index: 1, kind: input, shape index: {}]   ;;  %s1400_s2 = inlined_call_operand.hbm [shape: f32[2,1,1,8], index: 2, kind: input, shape index: {}]   ;;  %s1401_s3 = inlined_call_operand.vmem [shape: bf16[32,64], index: 3, kind: input, shape index: {}]   ;;  %s1402_s4 = inlined_call_operand.vmem [shape: bf16[32,64], index: 4, kind: input, shape index: {}]   ;;  %s1403_s5 = inlined_call_operand.vmem [shape: bf16[32,64], index: 5, kind: input, shape index: {}]   ;;  %s1404_s6 = inlined_call_operand.hbm [shape: bf16[32,64], index: 6, kind: input, shape index: {}]   ;;  %s1405_s7 = inlined_call_operand.vmem [shape: f32[1,64], index: 7, kind: input, shape index: {}]   ;;  %s1406_s8 = inlined_call_operand.vmem [shape: bf16[64,32], index: 8, kind: input, shape index: {}]   ;;  %s1407_s9 = inlined_call_operand.vmem [shape: f32[1,32], index: 9, kind: input, shape index: {}]   ;;  %s1408_s10 = inlined_call_operand.hbm [shape: f32[2,8,32], index: 10, kind: output, shape index: {}]  }
   0x1   :  { %16 = vsyncpa [#allocation6], 0 }
   0x2   :  { %17 = vsyncpa [#allocation9], 0 }
   0x3   :  { %18 = vsyncpa [#allocation4], 0  ;;  %s36_s15 = sshll.u32 %s1399_s1, 4  ;;  %s1148_s16 = smov [#allocation5]   ;;  %s37_s15 = int_to_ptr.hbm [resolvable:$true] %s36_s15 }
   0x4   :  { %s38_s17 = sshll.u32 %s1148_s16, 4  ;;  %s23_s20 = sshll.u32 %s1398_s0, 4  ;;  %s39_s17 = int_to_ptr.vmem [resolvable:$true] %s38_s17  ;;  %s24_s20 = int_to_ptr.hbm [resolvable:$true] %s23_s20 }
   0x5   :  { %s1149_s21 = smov 64   ;;  %s1150_s22 = smov 4  }
   0x6   :  { %44 = dma.hbm_to_vmem [thread:$0]  %s37_s15, 128, %s39_s17, [#allocation6], %s1149_s21, %s1149_s21, %s1150_s22  }
   0x7   :  { %s1151_s23 = smov [#allocation2]   ;;  %s49_s27 = sshll.u32 %s1400_s2, 4  ;;  %s50_s27 = int_to_ptr.hbm [resolvable:$true] %s49_s27 }
   0x8   :  { %s25_s24 = sshll.u32 %s1151_s23, 4  ;;  %s1152_s1 = smov [#allocation7]   ;;  %s26_s24 = int_to_ptr.vmem [resolvable:$true] %s25_s24 }
   0x9   :  { %31 = dma.hbm_to_vmem [thread:$0]  %s24_s20, 128, %s26_s24, [#allocation3], %s1149_s21, %s1149_s21, %s1150_s22  }
   0xa   :  { %s51_s28 = sshll.u32 %s1152_s1, 4  ;;  %s68_s0 = sshll.u32 %s1404_s6, 4  ;;  %s52_s28 = int_to_ptr.vmem [resolvable:$true] %s51_s28  ;;  %s69_s0 = int_to_ptr.hbm [resolvable:$true] %s68_s0 }
   0xb   :  { %s1153_s11 = smov 16   ;;  %s1154_s12 = smov 1  }
   0xc   :  { %57 = dma.hbm_to_vmem [thread:$0]  %s50_s27, 32, %s52_s28, [#allocation6], %s1153_s11, %s1153_s11, %s1154_s12  }
   0xd   :  { %s1155_s13 = smov [#allocation8]  }
   0xe   :  { %s70_s14 = sshll.u32 %s1155_s13, 4  ;;  %s71_s14 = int_to_ptr.vmem [resolvable:$true] %s70_s14 }
   0xf   :  { %76 = dma.hbm_to_vmem [thread:$0]  %s69_s0, 256, %s71_s14, [#allocation9], %s1149_s21, %s1149_s21, %s1150_s22  }
  0x10   :  { %1140 = dma.done.wait [#allocation3], 128  }
  0x11   :  { %1141 = vsyncadd [#allocation3], 4294967168 }
  0x12   :  { %1142 = dma.done.wait [#allocation6], 160  }
  0x13   :  { %1143 = vsyncadd [#allocation6], 4294967136 }
  0x14   :  { %1144 = dma.done.wait [#allocation9], 256  }
  0x15   :  { %1145 = vsyncadd [#allocation9], 4294967040  ;;  %v949_v0 = vld [vmem:[%s1401_s3 + $0x8] sm:$0xff]  ;;  %v948_v2 = vld [vmem:[%s1401_s3] sm:$0xff]  ;;  %vm125_vm0 = vcmask 261120   ;;  %vm299_vm1 = vcmask 130048  }
  0x16   :  { %v951_v1 = vld [vmem:[%s1402_s4 + $0x8] sm:$0xff]  ;;  %v950_v3 = vld [vmem:[%s1402_s4] sm:$0xff]  ;;  %135 = vmatpush.bf16.msra.mxu0 %v949_v0  ;;  %s1156_s3 = smov 96   ;;  %s1157_s4 = smov 112   ;;  %v1279_v39 = vld [vmem:[#allocation7] ss:$0 sm:$0xff] }
  0x17   :  { %175 = vmatpush.bf16.msra.mxu1 %v951_v1  ;;  %v1245_v4 = vld [vmem:[#allocation2] sm:$0xff]  ;;  %v947_v5 = vld [vmem:[#allocation5] sm:$0xff]  ;;  %s1158_s21 = smov 80   ;;  %vm338_vm2 = vcmask 64512   ;;  %v1284_v45 = vld [vmem:[#allocation7 + $0x1] ss:$0 sm:$0xff] }
  0x18   :  { %v953_v26 = vld [vmem:[%s1403_s5 + $0x8] sm:$0xff]  ;;  %v952_v27 = vld [vmem:[%s1403_s5] sm:$0xff]  ;;  %v954_v61 = vld [vmem:[#allocation8] sm:$0xff]  ;;  %vm366_vm3 = vcmask 1043456   ;;  %s1159_s5 = smov 32   ;;  %s1160_s26 = smov 48  }
  0x19   :  { %205 = vmatpush.bf16.msra.mxu2 %v953_v26  ;;  %v955_v57 = vld [vmem:[#allocation8 + $0x8] sm:$0xff]  ;;  %vm784_vm10 = vcmask 392192   ;;  %vm826_vm13 = vcmask 523264   ;;  %s1161_s2 = smov [#allocation10]   ;;  %s852_s17 = sshll.u32 %s1408_s10, 4  ;;  %s853_s17 = int_to_ptr.hbm [resolvable:$true] %s852_s17 }
  0x1a   :  { %136 = vmatpush.bf16.msra.mxu0 %v948_v2  ;;  %239 = vmatpush.bf16.msra.mxu3 %v955_v57  ;;  %s850_s15 = sshll.u32 %s1161_s2, 4  ;;  %s1162_s18 = smov 128   ;;  %s851_s15 = int_to_ptr.vmem [resolvable:$true] %s850_s15 }
  0x1b   :  { %176 = vmatpush.bf16.msra.mxu1 %v950_v3  ;;  %s1163_s19 = smov 8  }
  0x1d   :  { %879 = vmatmul.msk.bf16.vlgmr.msra.gmra.mxu0 %vm125_vm0, %v1245_v4  ;;  %206 = vmatpush.bf16.msra.mxu2 %v952_v27 }
  0x1e   :  { %892 = vmatmul.msk.bf16.vlgmr.msra.gmra.mxu1 %vm125_vm0, %v947_v5  ;;  %240 = vmatpush.bf16.msra.mxu3 %v954_v61 }
  0x20   :  { %901 = vmatmul.msk.bf16.vlgmr.msra.gmra.mxu2 %vm125_vm0, %v947_v5 }
  0x21   :  { %910 = vmatmul.msk.bf16.vlgmr.msra.gmra.mxu3 %vm125_vm0, %v1245_v4 }
  0x9a   :  { %v138_v6 = vpop.f32.mrf.mxu0 }
  0x9b   :  { %v178_v7 = vpop.f32.mrf.mxu1  ;;  %v143_v8 = vmul.f32 0.25, %v138_v6 }
  0x9c   :  { %v287_v9 = vpack.c.bf16 %v178_v7, %v178_v7 }
  0x9d   :  { %v285_v10 = vpack.c.bf16 %v143_v8, %v143_v8 }
  0x9e   :  { %v408_v11 = vunpack.c.l.b16 %v287_v9  ;;  %v304_v12 = vsel %vm299_vm1, %v287_v9, 0 }
  0x9f   :  { %313 = vmatpush.bf16.xpose.msrb.mxu0 %v304_v12  ;;  %v403_v13 = vunpack.c.l.b16 %v285_v10 }
  0xa0   :  { %v409_v14 = vpack.c.b16 %v408_v11, %v408_v11 }
  0xa1   :  { %v404_v15 = vpack.c.b16 %v403_v13, %v403_v13 }
  0xa2   :  { %534 = vrot.lane.b32.xlu2 %v409_v14, %s1156_s3  ;;  %410 = vrot.lane.b32.xlu0 %v409_v14, %s1157_s4  ;;  %v140_v16 = vpop.f32.mrf.mxu0 }
  0xa3   :  { %v180_v17 = vpop.f32.mrf.mxu1  ;;  %v144_v18 = vmul.f32 0.25, %v140_v16  ;;  %405 = vrot.lane.b32.xlu1 %v404_v15, %s1157_s4  ;;  %v208_v56 = vpop.f32.mrf.mxu2 }
  0xa4   :  { %v288_v19 = vpack.c.bf16 %v180_v17, %v180_v17  ;;  %v289_v58 = vpack.c.bf16 %v208_v56, %v208_v56 }
  0xa5   :  { %v286_v20 = vpack.c.bf16 %v144_v18, %v144_v18 }
  0xa6   :  { %v437_v21 = vunpack.c.l.b16 %v288_v19  ;;  %913 = vmatmul.msk.bf16.vlgmr.msrb.gmra.mxu0 %vm299_vm1, %v285_v10  ;;  %v323_v22 = vsel %vm299_vm1, %v288_v19, 0  ;;  %v368_v62 = vsel %vm366_vm3, %v289_v58, 0 }
  0xa7   :  { %332 = vmatpush.bf16.xpose.msrb.mxu1 %v323_v22  ;;  %v432_v23 = vunpack.c.l.b16 %v286_v20  ;;  %377 = vmatpush.bf16.msrb.mxu2 %v368_v62 }
  0xa8   :  { %v438_v24 = vpack.c.b16 %v437_v21, %v437_v21 }
  0xa9   :  { %v433_v25 = vpack.c.b16 %v432_v23, %v432_v23 }
  0xaa   :  { %557 = vrot.lane.b32.xlu2 %v438_v24, %s1156_s3  ;;  %439 = vrot.lane.b32.xlu0 %v438_v24, %s1157_s4 }
  0xab   :  { %434 = vrot.lane.b32.xlu1 %v433_v25, %s1157_s4  ;;  %v210_v59 = vpop.f32.mrf.mxu2 }
  0xac   :  { %v290_v60 = vpack.c.bf16 %v210_v59, %v210_v59 }
  0xae   :  { %914 = vmatmul.msk.bf16.vlgmr.msrb.gmra.mxu1 %vm299_vm1, %v286_v20  ;;  %v387_v63 = vsel %vm366_vm3, %v290_v60, 0 }
  0xaf   :  { %396 = vmatpush.bf16.msrb.mxu3 %v387_v63 }
  0xb2   :  { %646 = vrot.lane.b32.xlu2 %v409_v14, %s1158_s21  ;;  %532 = vrot.lane.b32.xlu0 %v404_v15, %s1156_s3 }
  0xb3   :  { %555 = vrot.lane.b32.xlu1 %v433_v25, %s1156_s3 }
  0xba   :  { %669 = vrot.lane.b32.xlu0 %v438_v24, %s1158_s21  ;;  %667 = vrot.lane.b32.xlu2 %v433_v25, %s1158_s21 }
  0xbb   :  { %644 = vrot.lane.b32.xlu1 %v404_v15, %s1158_s21 }
  0xfc   :  { %v535_v28 = vpop.permute.xlu2 %534 }
  0xfd   :  { %v540_v32 = vsel %vm299_vm1, %v535_v28, 0  ;;  %v509_v28 = vunpack.c.l.b16 %v290_v60 }
 0x104   :  { %v558_v29 = vpop.permute.xlu2 %557 }
 0x105   :  { %v563_v38 = vsel %vm299_vm1, %v558_v29, 0 }
 0x10c   :  { %v647_v33 = vpop.permute.xlu2 %646 }
 0x10d   :  { %v652_v36 = vsel %vm299_vm1, %v647_v33, 0  ;;  %v485_v33 = vunpack.c.l.b16 %v289_v58 }
 0x114   :  { %v411_v30 = vpop.permute.xlu0 %410  ;;  %v668_v55 = vpop.permute.xlu2 %667 }
 0x115   :  { %v416_v31 = vsel %vm299_vm1, %v411_v30, 0  ;;  %v406_v34 = vpop.permute.xlu1 %405  ;;  %v1309_v30 = vpack.c.b16 %v509_v28, %v509_v28 }
 0x116   :  { %425 = vmatpush.bf16.xpose.msra.mxu0 %v416_v31 }
 0x11c   :  { %v440_v35 = vpop.permute.xlu0 %439 }
 0x11d   :  { %v445_v37 = vsel %vm299_vm1, %v440_v35, 0  ;;  %917 = vmatmul.msk.bf16.vlgmr.msra.gmra.mxu0 %vm299_vm1, %v406_v34  ;;  %v435_v41 = vpop.permute.xlu1 %434  ;;  %v486_v35 = vpack.c.b16 %v485_v33, %v485_v33 }
 0x11e   :  { %549 = vmatpush.bf16.xpose.msrb.mxu0 %v540_v32  ;;  %454 = vmatpush.bf16.xpose.msra.mxu1 %v445_v37 }
 0x123   :  { %v315_v40 = vpop.f32.mrf.mxu0 }
 0x124   :  { %v316_v42 = vadd.f32 %v1279_v39, %v315_v40  ;;  %v533_v43 = vpop.permute.xlu0 %532 }
 0x125   :  { %918 = vmatmul.msk.bf16.vlgmr.msra.gmra.mxu1 %vm299_vm1, %v435_v41  ;;  %v556_v52 = vpop.permute.xlu1 %555 }
 0x126   :  { %661 = vmatpush.bf16.xpose.msra.mxu0 %v652_v36  ;;  %572 = vmatpush.bf16.xpose.msrb.mxu1 %v563_v38  ;;  %v339_v44 = vsel %vm338_vm2, %v316_v42, -inf }
 0x127   :  { %340 = vmax.xlane.f32.xlu0 %v339_v44 }
 0x12b   :  { %v334_v46 = vpop.f32.mrf.mxu1  ;;  %v317_v47 = vpop.f32.mrf.mxu0 }
 0x12c   :  { %v335_v48 = vadd.f32 %v1284_v45, %v334_v46  ;;  %v670_v49 = vpop.permute.xlu0 %669 }
 0x12d   :  { %v675_v50 = vsel %vm299_vm1, %v670_v49, 0  ;;  %921 = vmatmul.msk.bf16.vlgmr.msrb.gmra.mxu0 %vm299_vm1, %v533_v43  ;;  %v645_v54 = vpop.permute.xlu1 %644 }
 0x12e   :  { %684 = vmatpush.bf16.xpose.msra.mxu1 %v675_v50  ;;  %v342_v51 = vsel %vm338_vm2, %v335_v48, -inf }
 0x12f   :  { %343 = vmax.xlane.f32.xlu1 %v342_v51 }
 0x133   :  { %v336_v53 = vpop.f32.mrf.mxu1 }
 0x135   :  { %922 = vmatmul.msk.bf16.vlgmr.msrb.gmra.mxu1 %vm299_vm1, %v556_v52 }
 0x13d   :  { %925 = vmatmul.msk.bf16.vlgmr.msra.gmra.mxu0 %vm299_vm1, %v645_v54 }
 0x145   :  { %926 = vmatmul.msk.bf16.vlgmr.msra.gmra.mxu1 %vm299_vm1, %v668_v55 }
 0x19a   :  { %v427_v0 = vpop.f32.mrf.mxu0  ;;  %v341_v1 = vpop.xlane.xlu0 %340 }
 0x19b   :  { %v428_v2 = vadd.f32 %v1279_v39, %v427_v0  ;;  %v345_v3 = vsub.f32 %v316_v42, %v341_v1 }
 0x19d   :  { %v347_v5 = vmul.f32 1.442695, %v345_v3  ;;  %v460_v6 = vsel %vm338_vm2, %v428_v2, -inf }
 0x19e   :  { %461 = vmax.xlane.f32.xlu2 %v460_v6 }
 0x19f   :  { %980 = vpow2.f32 %v347_v5 }
 0x1a2   :  { %v429_v7 = vpop.f32.mrf.mxu0  ;;  %v456_v8 = vpop.f32.mrf.mxu1 }
 0x1a3   :  { %v457_v9 = vadd.f32 %v1284_v45, %v456_v8  ;;  %v344_v10 = vpop.xlane.xlu1 %343 }
 0x1a4   :  { %v346_v11 = vsub.f32 %v335_v48, %v344_v10 }
 0x1a5   :  { %v981_v12 = vpop.eup %980  ;;  %v463_v13 = vsel %vm338_vm2, %v457_v9, -inf }
 0x1a6   :  { %v349_v14 = vmul.f32 1.442695, %v346_v11  ;;  %464 = vmax.xlane.f32.xlu2 %v463_v13  ;;  %v351_v4 = vsel %vm338_vm2, %v981_v12, 0.0 }
 0x1a7   :  { %352 = vadd.xlane.f32.xlu1 %v351_v4 }
 0x1a8   :  { %982 = vpow2.f32 %v349_v14 }
 0x1aa   :  { %v458_v15 = vpop.f32.mrf.mxu1  ;;  %v551_v16 = vpop.f32.mrf.mxu0 }
 0x1ab   :  { %v552_v17 = vadd.f32 %v1279_v39, %v551_v16 }
 0x1ad   :  { %v578_v18 = vsel %vm338_vm2, %v552_v17, -inf }
 0x1ae   :  { %v983_v19 = vpop.eup %982  ;;  %579 = vmax.xlane.f32.xlu0 %v578_v18 }
 0x1af   :  { %v354_v20 = vsel %vm338_vm2, %v983_v19, 0.0 }
 0x1b0   :  { %355 = vadd.xlane.f32.xlu2 %v354_v20 }
 0x1b2   :  { %v553_v21 = vpop.f32.mrf.mxu0  ;;  %v574_v22 = vpop.f32.mrf.mxu1 }
 0x1b3   :  { %v575_v23 = vadd.f32 %v1284_v45, %v574_v22 }
 0x1b5   :  { %v581_v24 = vsel %vm338_vm2, %v575_v23, -inf }
 0x1b6   :  { %582 = vmax.xlane.f32.xlu1 %v581_v24 }
 0x1ba   :  { %v576_v25 = vpop.f32.mrf.mxu1  ;;  %v663_v26 = vpop.f32.mrf.mxu0 }
 0x1bb   :  { %v664_v27 = vadd.f32 %v1279_v39, %v663_v26 }
 0x1bd   :  { %v690_v29 = vsel %vm338_vm2, %v664_v27, -inf }
 0x1be   :  { %691 = vmax.xlane.f32.xlu2 %v690_v29 }
 0x1c2   :  { %511 = vrot.lane.b32.xlu0 %v1309_v30, %s1157_s4  ;;  %v665_v31 = vpop.f32.mrf.mxu0  ;;  %v686_v32 = vpop.f32.mrf.mxu1 }
 0x1c3   :  { %v1316_v36 = vadd.f32 %v1284_v45, %v686_v32 }
 0x1c5   :  { %v693_v37 = vsel %vm338_vm2, %v1316_v36, -inf }
 0x1ca   :  { %v688_v34 = vpop.f32.mrf.mxu1 }
 0x1cf   :  { %602 = vrot.lane.b32.xlu1 %v486_v35, %s1156_s3 }
 0x1d6   :  { %487 = vrot.lane.b32.xlu2 %v486_v35, %s1157_s4 }
 0x1ec   :  { %694 = vmax.xlane.f32.xlu0 %v693_v37 }
 0x211   :  { %v462_v38 = vpop.xlane.xlu2 %461 }
 0x212   :  { %v466_v39 = vsub.f32 %v428_v2, %v462_v38 }
 0x214   :  { %v468_v40 = vmul.f32 1.442695, %v466_v39 }
 0x216   :  { %984 = vpow2.f32 %v468_v40 }
 0x219   :  { %v465_v41 = vpop.xlane.xlu2 %464 }
 0x21a   :  { %v467_v42 = vsub.f32 %v457_v9, %v465_v41  ;;  %v353_v43 = vpop.xlane.xlu1 %352 }
 0x21b   :  { %986 = vrcp.f32 %v353_v43 }
 0x21c   :  { %v985_v44 = vpop.eup %984  ;;  %v470_v46 = vmul.f32 1.442695, %v467_v42 }
 0x21d   :  { %v472_v47 = vsel %vm338_vm2, %v985_v44, 0.0 }
 0x21e   :  { %988 = vpow2.f32 %v470_v46  ;;  %473 = vadd.xlane.f32.xlu0 %v472_v47 }
 0x221   :  { %v987_v45 = vpop.eup %986  ;;  %v580_v48 = vpop.xlane.xlu0 %579 }
 0x222   :  { %v359_v49 = vmul.f32 %v987_v45, %v981_v12  ;;  %v584_v50 = vsub.f32 %v552_v17, %v580_v48 }
 0x223   :  { %v356_v51 = vpop.xlane.xlu2 %355 }
 0x224   :  { %v989_v52 = vpop.eup %988  ;;  %v586_v53 = vmul.f32 1.442695, %v584_v50  ;;  %990 = vrcp.f32 %v356_v51  ;;  %v361_v54 = vpack.c.bf16 %v359_v49, %v359_v49 }
 0x225   :  { %v475_v55 = vsel %vm338_vm2, %v989_v52, 0.0 }
 0x226   :  { %992 = vpow2.f32 %v586_v53  ;;  %476 = vadd.xlane.f32.xlu1 %v475_v55  ;;  %915 = vmatmul.msk.bf16.vlgmr.msrb.gmra.mxu2 %vm338_vm2, %v361_v54 }
 0x229   :  { %v583_v56 = vpop.xlane.xlu1 %582 }
 0x22a   :  { %v991_v57 = vpop.eup %990  ;;  %v585_v58 = vsub.f32 %v575_v23, %v583_v56  ;;  %v1338_v23 = vpop.f32.mrf.mxu3 }
 0x22b   :  { %v360_v59 = vmul.f32 %v991_v57, %v983_v19 }
 0x22c   :  { %v993_v60 = vpop.eup %992  ;;  %v588_v61 = vmul.f32 1.442695, %v585_v58 }
 0x22d   :  { %v590_v62 = vsel %vm338_vm2, %v993_v60, 0.0  ;;  %v362_v63 = vpack.c.bf16 %v360_v59, %v360_v59 }
 0x22e   :  { %994 = vpow2.f32 %v588_v61  ;;  %591 = vadd.xlane.f32.xlu1 %v590_v62 }
 0x22f   :  { %916 = vmatmul.msk.bf16.vlgmr.msrb.gmra.mxu3 %vm338_vm2, %v362_v63 }
 0x231   :  { %v692_v0 = vpop.xlane.xlu2 %691 }
 0x232   :  { %v696_v1 = vsub.f32 %v664_v27, %v692_v0  ;;  %623 = vrot.lane.b32.xlu0 %v1309_v30, %s1156_s3  ;;  %v244_v31 = vpop.f32.mrf.mxu3 }
 0x234   :  { %v995_v2 = vpop.eup %994  ;;  %v698_v3 = vmul.f32 1.442695, %v696_v1  ;;  %v512_v5 = vpop.permute.xlu0 %511 }
 0x235   :  { %v517_v6 = vsel %vm366_vm3, %v512_v5, 0  ;;  %v593_v7 = vsel %vm338_vm2, %v995_v2, 0.0  ;;  %v957_v5 = vld [vmem:[%s1406_s8 + $0x8] sm:$0xff] }
 0x236   :  { %996 = vpow2.f32 %v698_v3  ;;  %594 = vadd.xlane.f32.xlu1 %v593_v7  ;;  %526 = vmatpush.bf16.msra.mxu3 %v517_v6  ;;  %v958_v3 = vld [vmem:[%s1406_s8 + $0x10] sm:$0xff]  ;;  %v978_v6 = vld [vmem:[%s1405_s7] ss:$0 sm:$0xff] }
 0x237   :  { %v243_v7 = vadd.f32 %v978_v6, %v1338_v23 }
 0x239   :  { %v488_v8 = vpop.permute.xlu2 %487 }
 0x23a   :  { %v493_v9 = vsel %vm366_vm3, %v488_v8, 0  ;;  %v245_v8 = vadd.f32 %v978_v6, %v244_v31 }
 0x23b   :  { %502 = vmatpush.bf16.msra.mxu2 %v493_v9  ;;  %v911_v9 = vmul.f32 -1.442695, %v243_v7 }
 0x23c   :  { %v997_v10 = vpop.eup %996 }
 0x23d   :  { %v702_v11 = vsel %vm338_vm2, %v997_v10, 0.0 }
 0x23e   :  { %703 = vadd.xlane.f32.xlu2 %v702_v11 }
 0x241   :  { %v603_v12 = vpop.permute.xlu1 %602 }
 0x242   :  { %v608_v13 = vsel %vm366_vm3, %v603_v12, 0 }
 0x243   :  { %617 = vmatpush.bf16.msrb.mxu2 %v608_v13 }
 0x24f   :  { %714 = vrot.lane.b32.xlu1 %v486_v35, %s1158_s21 }
 0x257   :  { %735 = vrot.lane.b32.xlu1 %v1309_v30, %s1158_s21 }
 0x25f   :  { %v695_v14 = vpop.xlane.xlu0 %694 }
 0x260   :  { %v697_v4 = vsub.f32 %v1316_v36, %v695_v14 }
 0x262   :  { %v700_v15 = vmul.f32 1.442695, %v697_v4  ;;  %v956_v4 = vld [vmem:[%s1406_s8] sm:$0xff] }
 0x264   :  { %998 = vpow2.f32 %v700_v15 }
 0x26a   :  { %v999_v16 = vpop.eup %998 }
 0x26b   :  { %v705_v17 = vsel %vm338_vm2, %v999_v16, 0.0 }
 0x26c   :  { %706 = vadd.xlane.f32.xlu0 %v705_v17 }
 0x291   :  { %v474_v18 = vpop.xlane.xlu0 %473 }
 0x292   :  { %1000 = vrcp.f32 %v474_v18 }
 0x298   :  { %v1001_v19 = vpop.eup %1000 }
 0x299   :  { %v480_v20 = vmul.f32 %v1001_v19, %v985_v44  ;;  %v477_v21 = vpop.xlane.xlu1 %476 }
 0x29a   :  { %1002 = vrcp.f32 %v477_v21 }
 0x29b   :  { %v482_v22 = vpack.c.bf16 %v480_v20, %v480_v20 }
 0x29d   :  { %919 = vmatmul.msk.bf16.vlgmr.msra.gmra.mxu2 %vm338_vm2, %v482_v22 }
 0x2a0   :  { %v1003_v24 = vpop.eup %1002 }
 0x2a1   :  { %v481_v25 = vmul.f32 %v1003_v24, %v989_v52  ;;  %v592_v26 = vpop.xlane.xlu1 %591 }
 0x2a2   :  { %1004 = vrcp.f32 %v592_v26 }
 0x2a3   :  { %v483_v27 = vpack.c.bf16 %v481_v25, %v481_v25 }
 0x2a4   :  { %v624_v28 = vpop.permute.xlu0 %623 }
 0x2a5   :  { %v629_v29 = vsel %vm366_vm3, %v624_v28, 0  ;;  %920 = vmatmul.msk.bf16.vlgmr.msra.gmra.mxu3 %vm338_vm2, %v483_v27 }
 0x2a6   :  { %638 = vmatpush.bf16.msrb.mxu3 %v629_v29 }
 0x2a8   :  { %v1005_v30 = vpop.eup %1004 }
 0x2a9   :  { %v598_v32 = vmul.f32 %v1005_v30, %v993_v60  ;;  %v1342_v33 = vpop.f32.mrf.mxu2  ;;  %v595_v34 = vpop.xlane.xlu1 %594 }
 0x2aa   :  { %1006 = vrcp.f32 %v595_v34 }
 0x2ab   :  { %v600_v35 = vpack.c.bf16 %v598_v32, %v598_v32 }
 0x2ad   :  { %923 = vmatmul.msk.bf16.vlgmr.msrb.gmra.mxu2 %vm338_vm2, %v600_v35 }
 0x2b0   :  { %v1007_v36 = vpop.eup %1006 }
 0x2b1   :  { %v599_v37 = vmul.f32 %v1007_v36, %v995_v2  ;;  %v381_v38 = vpop.f32.mrf.mxu2  ;;  %v704_v41 = vpop.xlane.xlu2 %703  ;;  %v959_v2 = vld [vmem:[%s1406_s8 + $0x18] sm:$0xff] }
 0x2b2   :  { %v1345_v39 = vpop.f32.mrf.mxu3  ;;  %1008 = vrcp.f32 %v704_v41  ;;  %834 = vmatpush.bf16.msrb.mxu0 %v959_v2 }
 0x2b3   :  { %v601_v40 = vpack.c.bf16 %v599_v37, %v599_v37 }
 0x2b5   :  { %924 = vmatmul.msk.bf16.vlgmr.msrb.gmra.mxu3 %vm338_vm2, %v601_v40 }
 0x2b6   :  { %835 = vmatpush.bf16.msrb.mxu0 %v958_v3 }
 0x2b8   :  { %v1009_v43 = vpop.eup %1008 }
 0x2b9   :  { %v710_v44 = vmul.f32 %v1009_v43, %v997_v10  ;;  %v912_v10 = vmul.f32 -1.442695, %v245_v8 }
 0x2ba   :  { %v400_v42 = vpop.f32.mrf.mxu3  ;;  %836 = vmatpush.bf16.msrb.mxu0 %v957_v5 }
 0x2bb   :  { %v712_v45 = vpack.c.bf16 %v710_v44, %v710_v44 }
 0x2be   :  { %837 = vmatpush.bf16.msrb.mxu0 %v956_v4 }
 0x2c1   :  { %v715_v46 = vpop.permute.xlu1 %714 }
 0x2c2   :  { %v720_v47 = vsel %vm366_vm3, %v715_v46, 0 }
 0x2c3   :  { %729 = vmatpush.bf16.msra.mxu2 %v720_v47 }
 0x2c6   :  { %927 = vmatmul.msk.bf16.vlgmr.msra.gmra.mxu2 %vm338_vm2, %v712_v45 }
 0x2c9   :  { %v736_v48 = vpop.permute.xlu1 %735 }
 0x2ca   :  { %v741_v49 = vsel %vm366_vm3, %v736_v48, 0 }
 0x2cb   :  { %750 = vmatpush.bf16.msra.mxu3 %v741_v49 }
 0x2df   :  { %v707_v50 = vpop.xlane.xlu0 %706 }
 0x2e0   :  { %1010 = vrcp.f32 %v707_v50 }
 0x2e1   :  { %1012 = vpow2.f32 %v911_v9 }
 0x2e2   :  { %1014 = vpow2.f32 %v912_v10 }
 0x2e6   :  { %v1011_v51 = vpop.eup %1010 }
 0x2e7   :  { %v711_v52 = vmul.f32 %v1011_v51, %v999_v16  ;;  %v1013_v11 = vpop.eup %1012 }
 0x2e8   :  { %v1015_v12 = vpop.eup %1014  ;;  %v253_v13 = vadd.f32 1.0, %v1013_v11 }
 0x2e9   :  { %v713_v53 = vpack.c.bf16 %v711_v52, %v711_v52  ;;  %v254_v14 = vadd.f32 1.0, %v1015_v12 }
 0x2ea   :  { %1016 = vrcp.f32 %v253_v13  ;;  %vm260_vm4 = vweird.f32 %v253_v13  ;;  %v266_v27 = vand.u32 2147483648, %v253_v13  ;;  %v264_v30 = vand.u32 2147483647, %v253_v13 }
 0x2eb   :  { %928 = vmatmul.msk.bf16.vlgmr.msra.gmra.mxu3 %vm338_vm2, %v713_v53  ;;  %1018 = vrcp.f32 %v254_v14  ;;  %vm275_vm6 = vweird.f32 %v254_v14  ;;  %v281_v28 = vand.u32 2147483648, %v254_v14  ;;  %v279_v32 = vand.u32 2147483647, %v254_v14  ;;  %v979_v53 = vld [vmem:[%s1407_s9] ss:$0 sm:$0xff] }
 0x2ec   :  { %v267_v40 = vor.u32 1.1754944e-38, %v266_v27  ;;  %vm265_vm11 = vcmp.eq.f32.partialorder %v264_v30, 8.507059e+37 }
 0x2ed   :  { %v282_v41 = vor.u32 1.1754944e-38, %v281_v28  ;;  %vm280_vm12 = vcmp.eq.f32.partialorder %v279_v32, 8.507059e+37 }
 0x2f0   :  { %v1017_v16 = vpop.eup %1016 }
 0x2f1   :  { %v1019_v17 = vpop.eup %1018  ;;  %v256_v18 = vmul.f32 %v1017_v16, %v253_v13  ;;  %vm261_vm5 = vweird.f32 %v1017_v16 }
 0x2f2   :  { %v271_v19 = vmul.f32 %v1019_v17, %v254_v14  ;;  %vm276_vm7 = vweird.f32 %v1019_v17  ;;  %vm1370_vm8 = vmor %vm260_vm4, %vm261_vm5 }
 0x2f3   :  { %v257_v21 = vsub.f32 1.0, %v256_v18  ;;  %vm1374_vm9 = vmor %vm275_vm6, %vm276_vm7 }
 0x2f4   :  { %v272_v22 = vsub.f32 1.0, %v271_v19 }
 0x2f5   :  { %v258_v23 = vmul.f32 %v1017_v16, %v257_v21 }
 0x2f6   :  { %v273_v24 = vmul.f32 %v1019_v17, %v272_v22 }
 0x2f7   :  { %v259_v26 = vadd.f32 %v1017_v16, %v258_v23 }
 0x2f8   :  { %v274_v31 = vadd.f32 %v1019_v17, %v273_v24 }
 0x2f9   :  { %v263_v38 = vsel %vm1370_vm8, %v1017_v16, %v259_v26 }
 0x2fa   :  { %v278_v43 = vsel %vm1374_vm9, %v1019_v17, %v274_v31  ;;  %v268_v45 = vsel %vm265_vm11, %v267_v40, %v263_v38 }
 0x2fb   :  { %v283_v48 = vsel %vm280_vm12, %v282_v41, %v278_v43 }
 0x320   :  { %v504_v54 = vpop.f32.mrf.mxu2 }
 0x321   :  { %758 = vrot.lane.b32.xlu1 %v504_v54, %s1153_s11 }
 0x328   :  { %v506_v55 = vpop.f32.mrf.mxu2  ;;  %v528_v56 = vpop.f32.mrf.mxu3 }
 0x329   :  { %760 = vrot.lane.b32.xlu2 %v528_v56, %s1153_s11 }
 0x330   :  { %v530_v57 = vpop.f32.mrf.mxu3  ;;  %v619_v58 = vpop.f32.mrf.mxu2 }
 0x331   :  { %766 = vrot.lane.b32.xlu1 %v619_v58, %s1159_s5 }
 0x338   :  { %v621_v59 = vpop.f32.mrf.mxu2  ;;  %v640_v60 = vpop.f32.mrf.mxu3 }
 0x339   :  { %768 = vrot.lane.b32.xlu0 %v640_v60, %s1159_s5 }
 0x340   :  { %v642_v61 = vpop.f32.mrf.mxu3 }
 0x349   :  { %v731_v62 = vpop.f32.mrf.mxu2 }
 0x34a   :  { %774 = vrot.lane.b32.xlu1 %v731_v62, %s1160_s26 }
 0x351   :  { %v733_v63 = vpop.f32.mrf.mxu2 }
 0x36e   :  { %v752_v0 = vpop.f32.mrf.mxu3 }
 0x36f   :  { %776 = vrot.lane.b32.xlu1 %v752_v0, %s1160_s26 }
 0x376   :  { %v754_v1 = vpop.f32.mrf.mxu3 }
 0x383   :  { %v761_v35 = vpop.permute.xlu2 %760 }
 0x384   :  { %v781_v44 = vsel %vm299_vm1, %v1345_v39, %v761_v35 }
 0x393   :  { %v759_v15 = vpop.permute.xlu1 %758 }
 0x394   :  { %v780_v36 = vsel %vm299_vm1, %v1342_v33, %v759_v15 }
 0x3a3   :  { %v767_v20 = vpop.permute.xlu1 %766 }
 0x3a4   :  { %v782_v42 = vsel %vm125_vm0, %v780_v36, %v767_v20 }
 0x3ab   :  { %v769_v37 = vpop.permute.xlu0 %768 }
 0x3ac   :  { %v783_v33 = vsel %vm125_vm0, %v781_v44, %v769_v37 }
 0x3bc   :  { %v775_v25 = vpop.permute.xlu1 %774 }
 0x3bd   :  { %v785_v46 = vsel %vm784_vm10, %v782_v42, %v775_v25 }
 0x3be   :  { %v787_v50 = vmul.f32 %v785_v46, %v268_v45 }
 0x3e1   :  { %v777_v47 = vpop.permute.xlu1 %776 }
 0x3e2   :  { %v786_v49 = vsel %vm784_vm10, %v783_v33, %v777_v47 }
 0x3e3   :  { %v788_v51 = vmul.f32 %v786_v49, %v283_v48 }
 0x3e5   :  { %v789_v52 = vpack.c.bf16 %v788_v51, %v787_v50 }
 0x3e7   :  { %945 = vmatmul.msk.bf16.vlgmr.msrb.gmra.mxu0 %vm826_vm13, %v789_v52 }
 0x464   :  { %v839_v54 = vpop.f32.mrf.mxu0 }
 0x465   :  { %v840_v39 = vadd.f32 %v979_v53, %v839_v54 }
 0x467   :  { %844 = vst.msk [vmem:[#allocation10] sm:$0xff] %vm125_vm0, %v840_v39 }
 0x46c   :  { %v841_v55 = vpop.f32.mrf.mxu0 }
 0x46d   :  { %v842_v56 = vadd.f32 %v979_v53, %v841_v55 }
 0x46f   :  { %845 = vst.msk [vmem:[#allocation10 + $0x8] sm:$0xff] %vm125_vm0, %v842_v56 }
 0x470   :  { %858 = dma.vmem_to_hbm [thread:$0]  %s851_s15, 256, %s853_s17, [#allocation4], %s1162_s18, %s1162_s18, %s1163_s19  }
 0x471   :  { %1146 = dma.done.wait [#allocation4], 256  }
 0x472   :  { %1147 = vsyncadd [#allocation4], 4294967040 }
 0x473   :  { %863 = vsyncpa [#allocation3], 1 }
 0x474   :  { %864 = vsyncpa [#allocation6], 1 }
 0x475   :  { %865 = vsyncpa [#allocation9], 1 }
 0x476   :  { %866 = vsyncpa [#allocation4], 1 }

</bundles_post_ra>
